<compile_context>
chip_gen: v5e
topology: v5e:2x2
jax: 0.10.0
libtpu: 0.0.40
codegen_flags: <defaults>
</compile_context>

<pallas_src>
import math
from functools import partial

import jax
import jax.numpy as jnp
from jax.experimental import pallas as pl
from jax.experimental.pallas import tpu as pltpu


# --------------------------------------------------------------------------------------------
# Kernels
# --------------------------------------------------------------------------------------------
def linear_kernel(x_ref, w_ref, b_ref, o_ref):
    # x_ref: (tmx, Cin)   node-major flattened rows
    # w_ref: (Cin, Cp)    pre-transposed, column-padded nn.Linear weight
    # b_ref: (1, Cp)      nn.Linear bias (f32)
    # o_ref: (tmx, Cp)    H rows (compute dtype)
    h = jnp.dot(x_ref[...], w_ref[...], preferred_element_type=jnp.float32)
    o_ref[...] = (h + b_ref[...]).astype(o_ref.dtype)


def agg_kernel(adj_ref, h_ref, bias_ref, o_ref):
    # adj_ref:  (tm, Np)   row tile of the pre-masked adjacency (adj_w * adj)
    # h_ref:    (Np, tn)   column tile of the batch-stacked H = [h_0 | h_1 | ...]
    # bias_ref: (1, tn)    batch-tiled extra bias (f32)
    # o_ref:    (tm, tn)   batch-stacked output tile
    out = jnp.dot(adj_ref[...], h_ref[...], preferred_element_type=jnp.float32)
    o_ref[...] = (out + bias_ref[...]).astype(o_ref.dtype)


# --------------------------------------------------------------------------------------------
# Tiling / spec helpers (all trace-time Python on static shapes)
# --------------------------------------------------------------------------------------------
def _round_up(x, m):
    return ((x + m - 1) // m) * m


def _vmem_capacity_bytes():
    """Per-core VMEM capacity; falls back to 64 MiB (v7x) which is safe on all generations."""
    try:
        cap = int(pltpu.get_tpu_info().vmem_capacity_bytes)
        if cap <= 0:
            raise ValueError
        return max(cap, 32 << 20)
    except Exception:
        return 64 << 20


def _invariant_spec(block_shape, index_map):
    """BlockSpec for a grid-invariant input: single-buffered (double-buffering it is waste)."""
    try:
        return pl.BlockSpec(block_shape, index_map, pipeline_mode=pl.Buffered(1))
    except Exception:  # older jax without pipeline_mode: plain (double-buffered) spec
        return pl.BlockSpec(block_shape, index_map)


def _pick_tile(extent, candidates, fits):
    opts = sorted({c for c in candidates if 0 < c <= extent and extent % c == 0}, reverse=True)
    for t in opts:
        if fits(t):
            return t
    return opts[-1] if opts else extent


# --------------------------------------------------------------------------------------------
# Forward wrapper
# --------------------------------------------------------------------------------------------
@partial(jax.jit, static_argnames=("compute_dtype",))
def dense_wgcn_forward(x, w_lin_t, b_lin, adj, adj_w, bias, compute_dtype=None):
    B, N, Cin = x.shape
    Cout = w_lin_t.shape[1]
    out_dtype = x.dtype
    cdt = jnp.dtype(compute_dtype) if compute_dtype is not None else jnp.dtype(out_dtype)
    c_item = int(jnp.dtype(cdt).itemsize)
    o_item = int(jnp.dtype(out_dtype).itemsize)

    # ---- generation-aware VMEM budget ------------------------------------------------------
    cap = _vmem_capacity_bytes()
    budget = int(cap * 0.55)                                    # tiling budget (headroom left)
    vmem_limit = max(32 << 20, min(int(cap * 0.85), cap - (8 << 20)))

    # ---- static shape padding --------------------------------------------------------------
    # Pad N so every row tile is (8,128)-friendly and there is no ragged tail tile.
    N_pad = _round_up(N, 8) if N <= 1024 else _round_up(N, 128)
    # Pad Cout so the batch-stacked width B*Cout_pad is lane-dense (multiple of 128).
    step = 128 // math.gcd(B, 128)
    Cout_pad = _round_up(Cout, step)
    BC = B * Cout_pad
    M = N_pad * B

    # ---- wrapper-side prep (cheap one-off XLA ops, kept out of the kernels) -----------------
    adj_eff = (adj_w * adj).reshape(N, N)                       # mask folded once
    adj_eff = jnp.pad(adj_eff, ((0, N_pad - N), (0, N_pad - N))).astype(cdt)
    x_nm = jnp.transpose(x, (1, 0, 2))                          # node-major (N, B, Cin)
    x_nm = jnp.pad(x_nm, ((0, N_pad - N), (0, 0), (0, 0)))
    x_flat = x_nm.reshape(M, Cin).astype(cdt)
    w_pad = jnp.pad(w_lin_t, ((0, 0), (0, Cout_pad - Cout))).astype(cdt)
    b_lin_pad = jnp.pad(b_lin, (0, Cout_pad - Cout)).reshape(1, Cout_pad).astype(jnp.float32)
    bias_tiled = jnp.tile(jnp.pad(bias, (0, Cout_pad - Cout)).reshape(1, Cout_pad),
                          (1, B)).astype(jnp.float32)

    # ---- kernel 1: fused linear over all (node, batch) rows --------------------------------
    tmx = _pick_tile(
        M, (M, 8192, 4096, 2048, 1024, 512, 256, 128, 64, 32, 16, 8),
        lambda t: 2 * t * (Cin + Cout_pad) * c_item + Cin * Cout_pad * c_item <= budget)

    lin_cost = pl.CostEstimate(
        flops=2 * M * Cin * Cout_pad, transcendentals=0,
        bytes_accessed=int(c_item * (M * Cin + Cin * Cout_pad + M * Cout_pad) + 4 * Cout_pad))

    h_flat = pl.pallas_call(
        linear_kernel,
        out_shape=jax.ShapeDtypeStruct((M, Cout_pad), cdt),
        grid_spec=pltpu.PrefetchScalarGridSpec(
            num_scalar_prefetch=0,
            grid=(M // tmx,),
            in_specs=[
                pl.BlockSpec((tmx, Cin), lambda i: (i, 0)),
                _invariant_spec((Cin, Cout_pad), lambda i: (0, 0)),
                _invariant_spec((1, Cout_pad), lambda i: (0, 0)),
            ],
            out_specs=pl.BlockSpec((tmx, Cout_pad), lambda i: (i, 0)),
        ),
        compiler_params=pltpu.CompilerParams(
            dimension_semantics=("parallel",),
            vmem_limit_bytes=vmem_limit),
        cost_estimate=lin_cost,
    )(x_flat, w_pad, b_lin_pad)

    # (N_pad*B, Cout_pad) -> (N_pad, B*Cout_pad): contiguous reshape, free layout plumbing.
    h_stacked = h_flat.reshape(N_pad, BC)

    # ---- kernel 2: aggregation  out = A @ H_stacked + bias ---------------------------------
    # Column tile of H / out (only kicks in when H alone threatens the budget, e.g. v7x 64 MiB).
    tn = BC
    while tn > 128 and tn % 256 == 0 and 2 * N_pad * tn * c_item > budget // 3:
        tn //= 2
    n_col = BC // tn
    h_bufs = 1 if n_col == 1 else 2

    tm = _pick_tile(
        N_pad, (N_pad, 4096, 2048, 1024, 512, 256, 128, 64, 32, 16, 8),
        lambda t: (2 * t * N_pad * c_item          # adjacency row tile (double-buffered)
                   + 2 * t * tn * o_item           # output tile (double-buffered)
                   + h_bufs * N_pad * tn * c_item  # H column block
                   + 4 * tn) <= budget)

    agg_cost = pl.CostEstimate(
        flops=2 * N_pad * N_pad * BC, transcendentals=0,
        bytes_accessed=int(c_item * (N_pad * N_pad + N_pad * BC)
                           + 4 * BC + o_item * N_pad * BC))

    if n_col == 1:
        h_spec = _invariant_spec((N_pad, tn), lambda i, j: (0, j))
        bias_spec = _invariant_spec((1, tn), lambda i, j: (0, j))
    else:
        h_spec = pl.BlockSpec((N_pad, tn), lambda i, j: (0, j))
        bias_spec = pl.BlockSpec((1, tn), lambda i, j: (0, j))

    out_stacked = pl.pallas_call(
        agg_kernel,
        out_shape=jax.ShapeDtypeStruct((N_pad, BC), out_dtype),
        grid_spec=pltpu.PrefetchScalarGridSpec(
            num_scalar_prefetch=0,
            # Columns innermost: the adjacency row tile keeps the same block index across j,
            # so it is not re-fetched.  (v7x sweep idea: pipeline_mode=pl.Buffered(3) on adj.)
            grid=(N_pad // tm, n_col),
            in_specs=[
                pl.BlockSpec((tm, N_pad), lambda i, j: (i, 0)),
                h_spec,
                bias_spec,
            ],
            out_specs=pl.BlockSpec((tm, tn), lambda i, j: (i, j)),
        ),
        compiler_params=pltpu.CompilerParams(
            dimension_semantics=("parallel", "parallel"),   # no scratch dependency any more
            vmem_limit_bytes=vmem_limit),
        cost_estimate=agg_cost,
    )(adj_eff, h_stacked, bias_tiled)

    # Un-stack & un-pad (layout plumbing outside the kernels): (N_pad, B*Cp) -> (B, N, Cout).
    out = out_stacked.reshape(N_pad, B, Cout_pad)[:N, :, :Cout]
    return jnp.transpose(out, (1, 0, 2)).astype(out_dtype)


# --------------------------------------------------------------------------------------------
# Parameter init + pure-JAX reference (mirrors DenseWGCN)
# --------------------------------------------------------------------------------------------
def init_params(key, N, Cin, Cout, init_adj_w=0.05):
    k_adj, k_w, k_lin_w, k_lin_b = jax.random.split(key, 4)

    # Binary adjacency (1, N, N) with self-loops forced to 1.
    adj = (jax.random.uniform(k_adj, (1, N, N)) > 0.5).astype(jnp.float32)
    eye = jnp.eye(N, dtype=jnp.float32)[None]
    adj = adj * (1.0 - eye) + eye

    # adj_w = adj * clamp(init_w + (rand-0.5)*0.1, 0.01, 1.0), diag = 1.0
    perturb = 0.1
    rnd = jax.random.uniform(k_w, (1, N, N))
    w_init = jnp.clip(init_adj_w + (rnd - 0.5) * perturb, 0.01, 1.0)
    adj_w = adj * w_init
    adj_w = adj_w * (1.0 - eye) + eye

    # nn.Linear(Cin, Cout): weight (Cout, Cin) ~ U(-1/sqrt(Cin), 1/sqrt(Cin)), bias same.
    bound = 1.0 / (Cin ** 0.5)
    w_lin = jax.random.uniform(k_lin_w, (Cout, Cin), minval=-bound, maxval=bound)
    b_lin = jax.random.uniform(k_lin_b, (Cout,), minval=-bound, maxval=bound)

    # Extra bias parameter, zero-init.
    bias = jnp.zeros((Cout,), dtype=jnp.float32)

    return adj, adj_w, w_lin.astype(jnp.float32), b_lin.astype(jnp.float32), bias


def reference_forward(x, w_lin, b_lin, adj, adj_w, bias):
    adj_w_eff = adj_w * adj                                            # (1, N, N)
    h = jnp.einsum("bnc,oc->bno", x, w_lin,
                   precision=jax.lax.Precision.HIGHEST) + b_lin        # nn.Linear
    out = jnp.einsum("znm,bmo->bno", adj_w_eff, h,
                     precision=jax.lax.Precision.HIGHEST)              # adjacency matmul
    return out + bias


if __name__ == "__main__":
    B, N, Cin, Cout = 2, 16, 8, 32
    key = jax.random.PRNGKey(0)
    k_x, k_p = jax.random.split(key)

    x = jax.random.normal(k_x, (B, N, Cin), dtype=jnp.float32)
    adj, adj_w, w_lin, b_lin, bias = init_params(k_p, N, Cin, Cout)

    ref = reference_forward(x, w_lin, b_lin, adj, adj_w, bias)

    # f32 path (bit-faithful to the module semantics).
    out = dense_wgcn_forward(x, w_lin.T, b_lin, adj, adj_w, bias)
    out = jax.block_until_ready(out)
    assert out.shape == (B, N, Cout)
    assert jnp.allclose(out, ref, atol=5e-4, rtol=5e-4), "f32 kernel mismatch vs reference"

    # bf16 compute path (recommended for large N: halves the HBM-bound N^2 adjacency stream).
    out_bf16 = dense_wgcn_forward(x, w_lin.T, b_lin, adj, adj_w, bias,
                                  compute_dtype=jnp.bfloat16)
    out_bf16 = jax.block_until_ready(out_bf16)
    assert out_bf16.shape == (B, N, Cout)
    assert jnp.allclose(out_bf16, ref, atol=1.5e-1, rtol=1e-1), "bf16 kernel mismatch"

    print("KERNEL_OK")
</pallas_src>

<mosaic_0001>
module attributes {stable_mosaic.version = 11 : i64} {
  func.func @linear_kernel(%arg0: i32, %arg1: memref<32x8xf32, #tpu.memory_space<vmem>>, %arg2: memref<8x64xf32, #tpu.memory_space<vmem>>, %arg3: memref<1x64xf32, #tpu.memory_space<vmem>>, %arg4: memref<32x64xf32, #tpu.memory_space<vmem>>) attributes {dimension_semantics = [#tpu.dimension_semantics<parallel>], iteration_bounds = array<i64: 1>, scalar_prefetch = 0 : i64, scratch_operands = 0 : i64, tpu.core_type = #tpu.core_type<tc>, window_params = [{transform_indices = @transform_0, window_bounds = array<i64: 32, 8>}, {pipeline_mode = #tpu.pipeline_mode<synchronous>, transform_indices = @transform_1, window_bounds = array<i64: 8, 64>}, {pipeline_mode = #tpu.pipeline_mode<synchronous>, transform_indices = @transform_2, window_bounds = array<i64: 1, 64>}, {transform_indices = @transform_3, window_bounds = array<i64: 32, 64>}]} {
    %c0 = arith.constant 0 : index
    %c0_0 = arith.constant 0 : index
    %0 = vector.load %arg1[%c0, %c0_0] : memref<32x8xf32, #tpu.memory_space<vmem>>, vector<32x8xf32>
    %c0_1 = arith.constant 0 : index
    %c0_2 = arith.constant 0 : index
    %1 = vector.load %arg2[%c0_1, %c0_2] : memref<8x64xf32, #tpu.memory_space<vmem>>, vector<8x64xf32>
    %cst = arith.constant dense<0.000000e+00> : vector<32x64xf32>
    %2 = tpu.matmul %0, %1, %cst {dimension_numbers = #tpu.dot_dimension_numbers<[1], [0], [0], [1], [0, 0, 1, 1], [], []>} : vector<32x8xf32>, vector<8x64xf32>, vector<32x64xf32> -> vector<32x64xf32>
    %c0_3 = arith.constant 0 : index
    %c0_4 = arith.constant 0 : index
    %3 = vector.load %arg3[%c0_3, %c0_4] : memref<1x64xf32, #tpu.memory_space<vmem>>, vector<1x64xf32>
    %4 = vector.broadcast %3 : vector<1x64xf32> to vector<32x64xf32>
    %5 = arith.addf %2, %4 : vector<32x64xf32>
    %c0_5 = arith.constant 0 : index
    %c0_6 = arith.constant 0 : index
    %6 = vector.load %arg4[%c0_5, %c0_6] : memref<32x64xf32, #tpu.memory_space<vmem>>, vector<32x64xf32>
    tpu.vector_store %arg4[%c0_5, %c0_6], %5 {strides = array<i32>} : memref<32x64xf32, #tpu.memory_space<vmem>>, vector<32x64xf32>,
    return
  }
  func.func @transform_0(%arg0: i32) -> (i32, i32) {
    %c0_i32 = arith.constant 0 : i32
    %c0_i32_0 = arith.constant 0 : i32
    return %arg0, %c0_i32 : i32, i32
  }
  func.func @transform_1(%arg0: i32) -> (i32, i32) {
    %c0_i32 = arith.constant 0 : i32
    %c0_i32_0 = arith.constant 0 : i32
    %c0_i32_1 = arith.constant 0 : i32
    return %c0_i32, %c0_i32_0 : i32, i32
  }
  func.func @transform_2(%arg0: i32) -> (i32, i32) {
    %c0_i32 = arith.constant 0 : i32
    %c0_i32_0 = arith.constant 0 : i32
    %c0_i32_1 = arith.constant 0 : i32
    return %c0_i32, %c0_i32_0 : i32, i32
  }
  func.func @transform_3(%arg0: i32) -> (i32, i32) {
    %c0_i32 = arith.constant 0 : i32
    %c0_i32_0 = arith.constant 0 : i32
    return %arg0, %c0_i32 : i32, i32
  }
}

module attributes {stable_mosaic.version = 11 : i64} {
  func.func @agg_kernel(%arg0: i32, %arg1: i32, %arg2: memref<16x16xf32, #tpu.memory_space<vmem>>, %arg3: memref<16x128xf32, #tpu.memory_space<vmem>>, %arg4: memref<1x128xf32, #tpu.memory_space<vmem>>, %arg5: memref<16x128xf32, #tpu.memory_space<vmem>>) attributes {dimension_semantics = [#tpu.dimension_semantics<parallel>, #tpu.dimension_semantics<parallel>], iteration_bounds = array<i64: 1, 1>, scalar_prefetch = 0 : i64, scratch_operands = 0 : i64, tpu.core_type = #tpu.core_type<tc>, window_params = [{transform_indices = @transform_0, window_bounds = array<i64: 16, 16>}, {pipeline_mode = #tpu.pipeline_mode<synchronous>, transform_indices = @transform_1, window_bounds = array<i64: 16, 128>}, {pipeline_mode = #tpu.pipeline_mode<synchronous>, transform_indices = @transform_2, window_bounds = array<i64: 1, 128>}, {transform_indices = @transform_3, window_bounds = array<i64: 16, 128>}]} {
    %c0 = arith.constant 0 : index
    %c0_0 = arith.constant 0 : index
    %0 = vector.load %arg2[%c0, %c0_0] : memref<16x16xf32, #tpu.memory_space<vmem>>, vector<16x16xf32>
    %c0_1 = arith.constant 0 : index
    %c0_2 = arith.constant 0 : index
    %1 = vector.load %arg3[%c0_1, %c0_2] : memref<16x128xf32, #tpu.memory_space<vmem>>, vector<16x128xf32>
    %cst = arith.constant dense<0.000000e+00> : vector<16x128xf32>
    %2 = tpu.matmul %0, %1, %cst {dimension_numbers = #tpu.dot_dimension_numbers<[1], [0], [0], [1], [0, 0, 1, 1], [], []>} : vector<16x16xf32>, vector<16x128xf32>, vector<16x128xf32> -> vector<16x128xf32>
    %c0_3 = arith.constant 0 : index
    %c0_4 = arith.constant 0 : index
    %3 = vector.load %arg4[%c0_3, %c0_4] : memref<1x128xf32, #tpu.memory_space<vmem>>, vector<1x128xf32>
    %4 = vector.broadcast %3 : vector<1x128xf32> to vector<16x128xf32>
    %5 = arith.addf %2, %4 : vector<16x128xf32>
    %c0_5 = arith.constant 0 : index
    %c0_6 = arith.constant 0 : index
    %6 = vector.load %arg5[%c0_5, %c0_6] : memref<16x128xf32, #tpu.memory_space<vmem>>, vector<16x128xf32>
    tpu.vector_store %arg5[%c0_5, %c0_6], %5 {strides = array<i32>} : memref<16x128xf32, #tpu.memory_space<vmem>>, vector<16x128xf32>,
    return
  }
  func.func @transform_0(%arg0: i32, %arg1: i32) -> (i32, i32) {
    %c0_i32 = arith.constant 0 : i32
    %c0_i32_0 = arith.constant 0 : i32
    return %arg0, %c0_i32 : i32, i32
  }
  func.func @transform_1(%arg0: i32, %arg1: i32) -> (i32, i32) {
    %c0_i32 = arith.constant 0 : i32
    %c0_i32_0 = arith.constant 0 : i32
    return %c0_i32, %arg1 : i32, i32
  }
  func.func @transform_2(%arg0: i32, %arg1: i32) -> (i32, i32) {
    %c0_i32 = arith.constant 0 : i32
    %c0_i32_0 = arith.constant 0 : i32
    return %c0_i32, %arg1 : i32, i32
  }
  func.func @transform_3(%arg0: i32, %arg1: i32) -> (i32, i32) {
    %c0_i32 = arith.constant 0 : i32
    return %arg0, %arg1 : i32, i32
  }
}

</mosaic_0001>

<bundles_post_ra>
// kernel: dense_wgcn_forward.2
= control target key start
LH: loop header
LB: loop body
LE: loop exit
PB: predicated region body
PF: predicated region fallthrough
CT: control target
= control target key end

     0   :  { %vm23_vm0 = vcmask 64512   ;;  %vm65_vm1 = vcmask 523264   ;;  %s132_s1 = inlined_call_operand.vmem [shape: f32[8,64], index: 1, kind: input, shape index: {}]   ;;  %s133_s0 = inlined_call_operand.vmem [shape: f32[32,8], index: 0, kind: input, shape index: {}]   ;;  %s134_s2 = inlined_call_operand.vmem [shape: f32[1,64], index: 2, kind: input, shape index: {}]   ;;  %s135_s3 = inlined_call_operand.vmem [shape: f32[32,64], index: 3, kind: output, shape index: {}]  }
   0x1   :  { %v18_v0 = vld [vmem:[%s132_s1] sm:$0xff]  ;;  %v16_v1 = vld [vmem:[%s133_s0 + $0x10] sm:$0xff]  ;;  %v17_v2 = vld [vmem:[%s133_s0 + $0x18] sm:$0xff] }
   0x2   :  { %79 = vmatpush.msra.mxu2 %v18_v0  ;;  %80 = vmatpush.msra.mxu3 %v18_v0  ;;  %v14_v3 = vld [vmem:[%s133_s0] sm:$0xff]  ;;  %v15_v4 = vld [vmem:[%s133_s0 + $0x8] sm:$0xff] }
   0x3   :  { %76 = vmatmul.msk.f32.vlgmr.msra.gmra.mxu2 %vm23_vm0, %v16_v1  ;;  %77 = vmatmul.msk.f32.vlgmr.msra.gmra.mxu3 %vm23_vm0, %v17_v2  ;;  %v81_v5 = vld [vmem:[%s134_s2] ss:$0 sm:$0xff] }
   0x4   :  { %51 = vmatpush.msra.mxu0 %v18_v0  ;;  %78 = vmatpush.msra.mxu1 %v18_v0 }
   0x5   :  { %74 = vmatmul.msk.f32.vlgmr.msra.gmra.mxu0 %vm23_vm0, %v14_v3  ;;  %75 = vmatmul.msk.f32.vlgmr.msra.gmra.mxu1 %vm23_vm0, %v15_v4 }
  0x82   :  { %v53_v6 = vpop.f32.mrf.mxu0  ;;  %v56_v7 = vpop.f32.mrf.mxu1 }
  0x83   :  { %v54_v8 = vadd.f32 %v81_v5, %v53_v6  ;;  %v57_v9 = vadd.f32 %v81_v5, %v56_v7 }
  0x85   :  { %66 = vst.msk [vmem:[%s135_s3] sm:$0xff] %vm65_vm1, %v54_v8 }
  0x86   :  { %67 = vst.msk [vmem:[%s135_s3 + $0x8] sm:$0xff] %vm65_vm1, %v57_v9  ;;  %v59_v10 = vpop.f32.mrf.mxu2  ;;  %v62_v11 = vpop.f32.mrf.mxu3 }
  0x87   :  { %v60_v12 = vadd.f32 %v81_v5, %v59_v10  ;;  %v63_v13 = vadd.f32 %v81_v5, %v62_v11 }
  0x89   :  { %68 = vst.msk [vmem:[%s135_s3 + $0x10] sm:$0xff] %vm65_vm1, %v60_v12 }
  0x8a   :  { %69 = vst.msk [vmem:[%s135_s3 + $0x18] sm:$0xff] %vm65_vm1, %v63_v13 }

// kernel: dense_wgcn_forward.3
= control target key start
LH: loop header
LB: loop body
LE: loop exit
PB: predicated region body
PF: predicated region fallthrough
CT: control target
= control target key end

     0   :  { %vm22_vm0 = vcmask 130048   ;;  %s104_s1 = inlined_call_operand.vmem [shape: f32[16,128], index: 1, kind: input, shape index: {}]   ;;  %s105_s0 = inlined_call_operand.vmem [shape: f32[16,16], index: 0, kind: input, shape index: {}]   ;;  %s106_s2 = inlined_call_operand.vmem [shape: f32[1,128], index: 2, kind: input, shape index: {}]   ;;  %s107_s3 = inlined_call_operand.vmem [shape: f32[16,128], index: 3, kind: output, shape index: {}]  }
   0x1   :  { %v17_v0 = vld [vmem:[%s104_s1 + $0x8] sm:$0xff]  ;;  %v16_v1 = vld [vmem:[%s104_s1] sm:$0xff] }
   0x2   :  { %43 = vmatpush.msra.mxu0 %v17_v0  ;;  %60 = vmatpush.msra.mxu1 %v17_v0  ;;  %v14_v2 = vld [vmem:[%s105_s0] sm:$0xff]  ;;  %v15_v3 = vld [vmem:[%s105_s0 + $0x8] sm:$0xff] }
   0x3   :  { %v62_v4 = vld [vmem:[%s106_s2] ss:$0 sm:$0xff] }
   0x4   :  { %44 = vmatpush.msra.mxu0 %v16_v1  ;;  %61 = vmatpush.msra.mxu1 %v16_v1 }
   0x5   :  { %58 = vmatmul.msk.f32.vlgmr.msra.gmra.mxu0 %vm22_vm0, %v14_v2  ;;  %59 = vmatmul.msk.f32.vlgmr.msra.gmra.mxu1 %vm22_vm0, %v15_v3 }
  0x82   :  { %v46_v5 = vpop.f32.mrf.mxu0  ;;  %v49_v6 = vpop.f32.mrf.mxu1 }
  0x83   :  { %v47_v7 = vadd.f32 %v62_v4, %v46_v5  ;;  %v50_v8 = vadd.f32 %v62_v4, %v49_v6 }
  0x85   :  { %52 = vst [vmem:[%s107_s3] sm:$0xff] %v47_v7 }
  0x86   :  { %53 = vst [vmem:[%s107_s3 + $0x8] sm:$0xff] %v50_v8 }

</bundles_post_ra>
